<compile_context>
chip_gen: v6e
topology: v6e:2x2x1
jax: 0.10.0
libtpu: 0.0.40
codegen_flags: <defaults>
</compile_context>

<pallas_src>
import functools
import math

import jax
import jax.numpy as jnp
from jax.experimental import pallas as pl
from jax.experimental.pallas import tpu as pltpu


def rmsnorm_kernel(x_ref, g_ref, o_ref, *, eps):
    # x_ref: (TM, D) tile of rows; g_ref: (1, D) gamma (resident across grid).
    x = x_ref[...].astype(jnp.float32)
    ms = jnp.mean(x * x, axis=-1, keepdims=True)            # (TM, 1)
    # Exact module semantics: x / (sqrt(mean(x^2)) + eps).
    # (pl.reciprocal(..., approx=True) would push this onto the idle EUP but
    #  costs ~1e-3 rel error; skipped to preserve exact reference parity.)
    inv = 1.0 / (jnp.sqrt(ms) + eps)
    g = g_ref[...].astype(jnp.float32)                       # hoisted broadcast
    o_ref[...] = (x * inv * g).astype(o_ref.dtype)


def _vmem_config():
    """Return (per-buffer byte budget, vmem_limit_bytes) for this TPU gen."""
    # Conservative default: safe on v7x (64 MiB VMEM/TC) and unknown parts.
    budget, limit = 2 * 1024 * 1024, 48 * 1024 * 1024
    try:
        kind = jax.devices()[0].device_kind.lower()
        if ("v5" in kind) or ("v6" in kind):                 # 128 MiB VMEM parts
            budget, limit = 4 * 1024 * 1024, 64 * 1024 * 1024
    except Exception:
        pass
    return budget, limit


def rms_norm(x, gamma, eps=1e-8):
    """Applies RMSNorm over the last axis of `x` with scale `gamma`."""
    orig_shape = x.shape
    D = orig_shape[-1]
    M = math.prod(orig_shape[:-1]) if len(orig_shape) > 1 else 1
    xf = x.reshape(M, D)
    g2 = gamma.reshape(1, D)

    itemsize = jnp.dtype(x.dtype).itemsize
    sublane = max(8, 32 // itemsize)        # 8 for f32, 16 for bf16, 32 for fp8
    budget_bytes, vmem_limit_bytes = _vmem_config()

    def round_up(n, m):
        return -(-n // m) * m

    # Row tile purely from the byte budget (no artificial row cap) ...
    tm = max(sublane, budget_bytes // max(1, D * itemsize))
    # ... but at least 2 grid tiles so both v7x TensorCores get work ...
    if M > sublane:
        tm = min(tm, round_up(pl.cdiv(M, 2), sublane))
    # ... and never larger than the (sublane-rounded) problem itself.
    tm = min(tm, round_up(M, sublane))
    tm = max(sublane, (tm // sublane) * sublane)

    grid = (pl.cdiv(M, tm),)   # partial last block handled by Pallas (rows indep.)

    # NOTE: D should ideally be a multiple of 128 (pad at model level if not)
    # so output stores stay lane-dense; block trailing dim == full D is legal
    # either way.
    out = pl.pallas_call(
        functools.partial(rmsnorm_kernel, eps=eps),
        out_shape=jax.ShapeDtypeStruct((M, D), x.dtype),
        grid=grid,
        in_specs=[
            pl.BlockSpec((tm, D), lambda i: (i, 0)),         # row tile of x
            pl.BlockSpec((1, D), lambda i: (0, 0)),          # gamma, resident
        ],
        out_specs=pl.BlockSpec((tm, D), lambda i: (i, 0)),
        compiler_params=pltpu.CompilerParams(
            dimension_semantics=("parallel",),               # rows independent
            vmem_limit_bytes=vmem_limit_bytes,
        ),
    )(xf, g2)

    return out.reshape(orig_shape)


def reference(x, gamma, eps=1e-8):
    rms = jnp.sqrt(jnp.mean(x * x, axis=-1, keepdims=True))
    return gamma * (x / (rms + eps))


if __name__ == "__main__":
    # Small demo shapes: batch=2, 16x16 pair/spatial map, feature dim 128
    # (lane-dense trailing dim). M = 2*16*16 = 512 rows -> tm capped at 256,
    # grid of 2 row tiles (exercises the pipeline and the parallel axis).
    B, S, D = 2, 16, 128
    key = jax.random.PRNGKey(0)
    kx, kg = jax.random.split(key)
    x = jax.random.normal(kx, (B, S, S, D), jnp.float32)
    # Module initializes gamma to ones; perturb it so the scale path is tested.
    gamma = 1.0 + 0.1 * jax.random.normal(kg, (D,), jnp.float32)

    out = rms_norm(x, gamma)
    out = jax.block_until_ready(out)

    ref = jax.block_until_ready(reference(x, gamma))
    assert out.shape == x.shape
    err = jnp.max(jnp.abs(out - ref))
    assert jnp.allclose(out, ref, atol=1e-5, rtol=1e-5), f"max abs err {err}"

    print("KERNEL_OK")
</pallas_src>

<mosaic_0001>
module attributes {stable_mosaic.version = 11 : i64} {
  func.func @rmsnorm_kernel(%arg0: i32, %arg1: memref<256x128xf32, #tpu.memory_space<vmem>>, %arg2: memref<1x128xf32, #tpu.memory_space<vmem>>, %arg3: memref<256x128xf32, #tpu.memory_space<vmem>>) attributes {dimension_semantics = [#tpu.dimension_semantics<parallel>], iteration_bounds = array<i64: 2>, scalar_prefetch = 0 : i64, scratch_operands = 0 : i64, tpu.core_type = #tpu.core_type<tc>, window_params = [{transform_indices = @transform_0, window_bounds = array<i64: 256, 128>}, {pipeline_mode = #tpu.pipeline_mode<synchronous>, transform_indices = @transform_1, window_bounds = array<i64: 1, 128>}, {transform_indices = @transform_2, window_bounds = array<i64: 256, 128>}]} {
    %c0 = arith.constant 0 : index
    %c0_0 = arith.constant 0 : index
    %0 = vector.load %arg1[%c0, %c0_0] : memref<256x128xf32, #tpu.memory_space<vmem>>, vector<256x128xf32>
    %1 = arith.mulf %0, %0 : vector<256x128xf32>
    %cst = arith.constant dense<0.000000e+00> : vector<256xf32>
    %2 = vector.multi_reduction <add>, %1, %cst [1] : vector<256x128xf32> to vector<256xf32>
    %3 = vector.shape_cast %2 : vector<256xf32> to vector<256x1xf32>
    %cst_1 = arith.constant 1.280000e+02 : f32
    %4 = vector.broadcast %cst_1 : f32 to vector<256x1xf32>
    %5 = arith.divf %3, %4 : vector<256x1xf32>
    %6 = math.sqrt %5 : vector<256x1xf32>
    %cst_2 = arith.constant 9.99999993E-9 : f32
    %7 = vector.broadcast %cst_2 : f32 to vector<256x1xf32>
    %8 = arith.addf %6, %7 : vector<256x1xf32>
    %cst_3 = arith.constant 1.000000e+00 : f32
    %9 = vector.broadcast %cst_3 : f32 to vector<256x1xf32>
    %10 = arith.divf %9, %8 : vector<256x1xf32>
    %c0_4 = arith.constant 0 : index
    %c0_5 = arith.constant 0 : index
    %11 = vector.load %arg2[%c0_4, %c0_5] : memref<1x128xf32, #tpu.memory_space<vmem>>, vector<1x128xf32>
    %12 = vector.broadcast %10 : vector<256x1xf32> to vector<256x128xf32>
    %13 = arith.mulf %0, %12 : vector<256x128xf32>
    %14 = vector.broadcast %11 : vector<1x128xf32> to vector<256x128xf32>
    %15 = arith.mulf %13, %14 : vector<256x128xf32>
    %c0_6 = arith.constant 0 : index
    %c0_7 = arith.constant 0 : index
    %16 = vector.load %arg3[%c0_6, %c0_7] : memref<256x128xf32, #tpu.memory_space<vmem>>, vector<256x128xf32>
    tpu.vector_store %arg3[%c0_6, %c0_7], %15 {strides = array<i32>} : memref<256x128xf32, #tpu.memory_space<vmem>>, vector<256x128xf32>,
    return
  }
  func.func @transform_0(%arg0: i32) -> (i32, i32) {
    %c0_i32 = arith.constant 0 : i32
    %c0_i32_0 = arith.constant 0 : i32
    return %arg0, %c0_i32 : i32, i32
  }
  func.func @transform_1(%arg0: i32) -> (i32, i32) {
    %c0_i32 = arith.constant 0 : i32
    %c0_i32_0 = arith.constant 0 : i32
    %c0_i32_1 = arith.constant 0 : i32
    return %c0_i32, %c0_i32_0 : i32, i32
  }
  func.func @transform_2(%arg0: i32) -> (i32, i32) {
    %c0_i32 = arith.constant 0 : i32
    %c0_i32_0 = arith.constant 0 : i32
    return %arg0, %c0_i32 : i32, i32
  }
}

</mosaic_0001>

<bundles_post_ra>
// kernel: tpu_custom_call.1
= control target key start
LH: loop header
LB: loop body
LE: loop exit
PB: predicated region body
PF: predicated region fallthrough
CT: control target
= control target key end

     0   :  { %7 = vsyncpa [#allocation3], 0  ;;  %s1885_s0 = inlined_call_operand.hbm [shape: f32[512,128], index: 0, kind: input, shape index: {}]   ;;  %s1886_s1 = inlined_call_operand.vmem [shape: f32[1,128], index: 1, kind: input, shape index: {}]   ;;  %s1887_s2 = inlined_call_operand.hbm [shape: f32[512,128], index: 2, kind: output, shape index: {}]  }
   0x1   :  { %9 = vsyncpa [#allocation3 + $0x1], 0 }
   0x2   :  { %10 = vsyncpa [#allocation4], 0 }
   0x3   :  { %12 = vsyncpa [#allocation4 + $0x1], 0  ;;  %s1149_s9 = smov 0   ;;  %s1151_s10 = smov 0  }
   0x4   :  { %s1153_s11 = smov 0   ;;  %s1155_s12 = smov 0  }
   0x5 LB: > { %s1170_s13 = sadd.s32 4294967295, %s1126_s12   ;;  %s835_s14 = sadd.s32 4294967294, %s1126_s12   ;;  %s1126_s12 = sphi %s1155_s12, %s1902_s12   ;;  %s1122_s11 = sphi %s1153_s11, %s1901_s11   ;;  %s1118_s10 = sphi %s1151_s10, %s1900_s10   ;;  %s1114_s9 = sphi %s1149_s9, %s1899_s9  }
   0x6   : > { %s1174_s15 = sadd.s32 1, %s1126_s12   ;;  %s25_s16 = sadd.s32 1, %s1122_s11 }
   0x7   : > { %s22_s17 = ssub.s32 %s1126_s12, %s1174_s15  ;;  %p32_p0 = scmp.ne.s32.totalorder %s1122_s11, %s1118_s10 }
   0x8   : > { %p23_p1 = scmp.eq.s32.totalorder %s22_s17, 0  ;;  %p33_p2 = scmp.eq.s32.totalorder %s1126_s12, 0 }
   0x9   : > { %p38_p3 = scmp.ne.s32.totalorder %s1118_s10, %s1114_s9  ;;  %p39_p4 = scmp.eq.s32.totalorder %s1170_s13, 0 }
   0xa   : > { %s1186_s18 = scalar_select %p23_p1, %s1122_s11, %s25_s16  }
   0xb   : > { %p1188_p5 = por %p33_p2, %p32_p0  ;;  %p1192_p6 = por %p39_p4, %p38_p3 }
   0xc   : > { %p83_p7 = scmp.eq.s32.totalorder %s1170_s13, 1  ;;  %p89_p8 = scmp.eq.s32.totalorder %s835_s14, 1 }
   0xd   : > { %s1891_s20 = scalar_select %p1192_p6, 1, 0 }
   0xe   : > { %p864_p10 = scmp.lt.s32.totalorder %s1126_s12, 2  ;;  %p1199_p11 = por %p83_p7, %p32_p0 }
   0xf   : > { %p1203_p12 = por %p89_p8, %p38_p3  ;;  %s112_s23 = sand.u32 1, %s1122_s11  }
  0x10   : > { %s1892_s21 = scalar_select %p1199_p11, 1, 0 }
  0x11   : > { %s1893_s22 = scalar_select %p1203_p12, 1, 0 }
  0x12   : > { %s850_s24 = sshll.u32 %s1126_s12, 12  ;;  %s838_s25 = sshll.u32 %s112_s23, 8 }
  0x13   : > { %s1212_s28 = scalar_lea.hbm %s1885_s0, %s850_s24  ;;  %s116_s29 = scalar_lea.vmem [#allocation2], %s838_s25 }
  0x14   : > { %s123_s30 = sshll.u32 %s116_s29, 4  ;;  %p1216_p13 = pnand %p864_p10, %p1188_p5  ;;  %s1220_s30 = int_to_ptr.vmem [resolvable:$true] %s123_s30 }
  0x15   : > { %s1222_s4 = scalar_lea.sflag [#allocation3], %s112_s23  ;;  %s1034_s5 = scalar_lea.hbm %s1212_s28, 4096 }
  0x16   : > { %p1035_p0 = scmp.ne.s32.totalorder %s1212_s28, %s1034_s5  ;;  %p1036_p1 = pneg %p1216_p13 }
  0x17   : > { %s1039_s8 = scalar_lea.hbm %s1885_s0, 8192  ;;  %p1040_p4 = scmp.lt.s32.totalorder %s1212_s28, %s1885_s0 }
  0x18   : > { %p1037_p2 = pnand %p1036_p1, %p1035_p0  ;;  %p1041_p5 = scmp.lt.s32.totalorder %s1039_s8, %s1034_s5 }
  0x1a   : > { %p1038_p3 = pneg %p1037_p2  ;;  %p1042_p7 = por %p1041_p5, %p1040_p4 }
  0x1c   : > { %p1043_p8 = pnand %p1042_p7, %p1038_p3 }
  0x1e   : > { %1046 = shalt.err (!%p1043_p8)
}
  0x1f   : > { %s1047_s17 = scalar_lea.vmem %s1220_s30, 4096  ;;  %s1128_s19 = smov [#allocation2]  }
  0x20   : > { %p1048_p10 = scmp.ne.s32.totalorder %s1220_s30, %s1047_s17  ;;  %s1052_s23 = sshll.u32 %s1128_s19, 4  ;;  %s1053_s23 = int_to_ptr.vmem [resolvable:$false] %s1052_s23 }
  0x21   : > { %s1054_s24 = scalar_lea.vmem %s1053_s23, 8192  ;;  %p1055_p2 = scmp.lt.s32.totalorder %s1220_s30, %s1053_s23 }
  0x22   : > { %p1050_p9 = pnand %p1048_p10, %p1036_p1  ;;  %p1056_p12 = scmp.lt.s32.totalorder %s1054_s24, %s1047_s17 }
  0x24   : > { %p1051_p0 = pneg %p1050_p9  ;;  %p1057_p11 = por %p1056_p12, %p1055_p2 }
  0x26   : > { %p1058_p6 = pnand %p1057_p11, %p1051_p0 }
  0x28   : > { %1061 = shalt.err (!%p1058_p6)
}
  0x29   : > { %s1129_s25 = smov 128   ;;  %s1130_s26 = smov 8  }
  0x2a   : > { %859 = dma.hbm_to_vmem [thread:$0]  (!%p1216_p13), %s1212_s28, 4096, %s1220_s30, %s1222_s4, %s1129_s25, %s1129_s25, %s1130_s26  }
  0x2b   : > { %p841_p9 = scmp.ge.s32.totalorder %s1126_s12, 1  ;;  %p131_p1 = scmp.lt.s32.totalorder %s1126_s12, 3 }
  0x2d   : > { %p132_p3 = pnand %p841_p9, %p131_p1 }
  0x2e   : > { %s1246_s27 = sand.u32 (!%p132_p3), 1, %s1118_s10   ;;  %p1895_p6 = scmp.ne.s32.totalorder (!%p132_p3), %s1891_s20, 0 }
  0x2f   : > { %135 = sbr.rel (%p132_p3) target bundleno = 331 (0x14b), region = 28  ;;  %s842_s29 = sshll.u32 (!%p132_p3), %s1246_s27, 8 }
  0x30   : > { %s138_s5 = scalar_lea.sflag (!%p132_p3), [#allocation3], %s1246_s27  ;;  %s1252_s6 = scalar_lea.vmem (!%p132_p3), [#allocation2], %s842_s29 }
  0x34   : > { %1105 = dma.done.wait (%p1895_p6), %s138_s5, 4096  }
  0x35   : > { %1107 = vsyncadd (%p1895_p6), %s138_s5, 4294963200  ;;  %v1259_v0 = vld [vmem:[%s1252_s6 + $0x10] sm:$0xff]  ;;  %v1262_v1 = vld [vmem:[%s1252_s6] sm:$0xff]  ;;  %s1531_s30 = scalar_lea.vmem [#allocation5], %s842_s29  ;;  %s851_s3 = sshll.u32 %s1170_s13, 12 }
  0x36   : > { %v1265_v2 = vld [vmem:[%s1252_s6 + $0x18] sm:$0xff]  ;;  %v198_v3 = vmul.f32 %v1259_v0, %v1259_v0  ;;  %v196_v4 = vmul.f32 %v1262_v1, %v1262_v1  ;;  %v1272_v5 = vld [vmem:[%s1252_s6 + $0x8] sm:$0xff]  ;;  %v1282_v9 = vld [vmem:[%s1252_s6 + $0x20] sm:$0xff]  ;;  %s762_s4 = sshll.u32 %s1531_s30, 4  ;;  %s1837_s14 = scalar_lea.hbm %s1887_s2, %s851_s3  ;;  %s1839_s4 = int_to_ptr.vmem [resolvable:$true] %s762_s4 }
  0x37   : > { %v199_v6 = vmul.f32 %v1265_v2, %v1265_v2  ;;  %v197_v7 = vmul.f32 %v1272_v5, %v1272_v5  ;;  %v1279_v8 = vld [vmem:[%s1252_s6 + $0x28] sm:$0xff]  ;;  %v200_v11 = vmul.f32 %v1282_v9, %v1282_v9  ;;  %v1289_v12 = vld [vmem:[%s1252_s6 + $0x38] sm:$0xff]  ;;  %v1292_v13 = vld [vmem:[%s1252_s6 + $0x30] sm:$0xff]  ;;  %s749_s13 = scalar_lea.sflag [#allocation4], %s1246_s27  ;;  %s1062_s16 = scalar_lea.vmem %s1839_s4, 4096 }
  0x38   : > { %232 = vadd.xlane.f32.xlu1 %v198_v3  ;;  %228 = vadd.xlane.f32.xlu0 %v196_v4  ;;  %v201_v10 = vmul.f32 %v1279_v8, %v1279_v8  ;;  %v203_v14 = vmul.f32 %v1289_v12, %v1289_v12  ;;  %v202_v15 = vmul.f32 %v1292_v13, %v1292_v13  ;;  %v1299_v16 = vld [vmem:[%s1252_s6 + $0x48] sm:$0xff]  ;;  %v1302_v17 = vld [vmem:[%s1252_s6 + $0x40] sm:$0xff]  ;;  %v1309_v20 = vld [vmem:[%s1252_s6 + $0x58] sm:$0xff]  ;;  %p1063_p11 = scmp.ne.s32.totalorder %s1839_s4, %s1062_s16  ;;  %p1896_p12 = scmp.ne.s32.totalorder %s1892_s21, 0 }
  0x39   : > { %v205_v18 = vmul.f32 %v1299_v16, %v1299_v16  ;;  %v204_v19 = vmul.f32 %v1302_v17, %v1302_v17  ;;  %v1312_v21 = vld [vmem:[%s1252_s6 + $0x50] sm:$0xff]  ;;  %v207_v22 = vmul.f32 %v1309_v20, %v1309_v20  ;;  %v1319_v24 = vld [vmem:[%s1252_s6 + $0x68] sm:$0xff]  ;;  %v1322_v25 = vld [vmem:[%s1252_s6 + $0x60] sm:$0xff]  ;;  %s1131_s17 = smov [#allocation5]  }
  0x3a   : > { %v206_v23 = vmul.f32 %v1312_v21, %v1312_v21  ;;  %v209_v26 = vmul.f32 %v1319_v24, %v1319_v24  ;;  %v208_v27 = vmul.f32 %v1322_v25, %v1322_v25  ;;  %v1329_v28 = vld [vmem:[%s1252_s6 + $0x78] sm:$0xff]  ;;  %v1332_v29 = vld [vmem:[%s1252_s6 + $0x70] sm:$0xff]  ;;  %v1339_v32 = vld [vmem:[%s1252_s6 + $0x88] sm:$0xff]  ;;  %p1064_p13 = pnand %p1063_p11, %p1896_p12  ;;  %s1066_s19 = sshll.u32 %s1131_s17, 4  ;;  %s1067_s19 = int_to_ptr.vmem [resolvable:$false] %s1066_s19 }
  0x3b   : > { %v211_v30 = vmul.f32 %v1329_v28, %v1329_v28  ;;  %v210_v31 = vmul.f32 %v1332_v29, %v1332_v29  ;;  %v1342_v33 = vld [vmem:[%s1252_s6 + $0x80] sm:$0xff]  ;;  %v213_v34 = vmul.f32 %v1339_v32, %v1339_v32  ;;  %v1349_v36 = vld [vmem:[%s1252_s6 + $0x98] sm:$0xff]  ;;  %v1352_v37 = vld [vmem:[%s1252_s6 + $0x90] sm:$0xff]  ;;  %s1068_s23 = scalar_lea.vmem %s1067_s19, 8192  ;;  %p1069_p5 = scmp.lt.s32.totalorder %s1839_s4, %s1067_s19 }
  0x3c   : > { %234 = vadd.xlane.f32.xlu1 %v199_v6  ;;  %230 = vadd.xlane.f32.xlu0 %v197_v7  ;;  %v212_v35 = vmul.f32 %v1342_v33, %v1342_v33  ;;  %v215_v38 = vmul.f32 %v1349_v36, %v1349_v36  ;;  %v214_v39 = vmul.f32 %v1352_v37, %v1352_v37  ;;  %v1359_v40 = vld [vmem:[%s1252_s6 + $0xa8] sm:$0xff]  ;;  %v1362_v41 = vld [vmem:[%s1252_s6 + $0xa0] sm:$0xff]  ;;  %v1369_v44 = vld [vmem:[%s1252_s6 + $0xb8] sm:$0xff]  ;;  %p1065_p4 = pneg %p1064_p13  ;;  %p1070_p7 = scmp.lt.s32.totalorder %s1068_s23, %s1062_s16 }
  0x3d   : > { %v217_v42 = vmul.f32 %v1359_v40, %v1359_v40  ;;  %v216_v43 = vmul.f32 %v1362_v41, %v1362_v41  ;;  %v1372_v45 = vld [vmem:[%s1252_s6 + $0xb0] sm:$0xff]  ;;  %v219_v46 = vmul.f32 %v1369_v44, %v1369_v44  ;;  %v1379_v48 = vld [vmem:[%s1252_s6 + $0xc8] sm:$0xff]  ;;  %v1382_v49 = vld [vmem:[%s1252_s6 + $0xc0] sm:$0xff] }
  0x3e   : > { %v218_v47 = vmul.f32 %v1372_v45, %v1372_v45  ;;  %v221_v50 = vmul.f32 %v1379_v48, %v1379_v48  ;;  %v220_v51 = vmul.f32 %v1382_v49, %v1382_v49  ;;  %v1389_v52 = vld [vmem:[%s1252_s6 + $0xd8] sm:$0xff]  ;;  %v1392_v53 = vld [vmem:[%s1252_s6 + $0xd0] sm:$0xff]  ;;  %v193_v56 = vld [vmem:[%s1252_s6 + $0xe8] sm:$0xff]  ;;  %p1071_p8 = por %p1070_p7, %p1069_p5 }
  0x3f   : > { %v223_v54 = vmul.f32 %v1389_v52, %v1389_v52  ;;  %v222_v55 = vmul.f32 %v1392_v53, %v1392_v53  ;;  %v192_v57 = vld [vmem:[%s1252_s6 + $0xe0] sm:$0xff]  ;;  %v225_v58 = vmul.f32 %v193_v56, %v193_v56  ;;  %v195_v60 = vld [vmem:[%s1252_s6 + $0xf8] sm:$0xff]  ;;  %v194_v61 = vld [vmem:[%s1252_s6 + $0xf0] sm:$0xff] }
  0x40   : > { %238 = vadd.xlane.f32.xlu1 %v201_v10  ;;  %236 = vadd.xlane.f32.xlu0 %v200_v11  ;;  %v224_v59 = vmul.f32 %v192_v57, %v192_v57  ;;  %v227_v62 = vmul.f32 %v195_v60, %v195_v60  ;;  %v226_v63 = vmul.f32 %v194_v61, %v194_v61  ;;  %p1072_p10 = pnand %p1071_p8, %p1065_p4 }
  0x44   : > { %242 = vadd.xlane.f32.xlu1 %v203_v14  ;;  %240 = vadd.xlane.f32.xlu0 %v202_v15 }
  0x48   : > { %246 = vadd.xlane.f32.xlu1 %v205_v18  ;;  %244 = vadd.xlane.f32.xlu0 %v204_v19 }
  0x4c   : > { %250 = vadd.xlane.f32.xlu1 %v207_v22  ;;  %248 = vadd.xlane.f32.xlu0 %v206_v23 }
  0x50   : > { %254 = vadd.xlane.f32.xlu1 %v209_v26  ;;  %252 = vadd.xlane.f32.xlu0 %v208_v27 }
  0x54   : > { %258 = vadd.xlane.f32.xlu1 %v211_v30  ;;  %256 = vadd.xlane.f32.xlu0 %v210_v31 }
  0x58   : > { %262 = vadd.xlane.f32.xlu1 %v213_v34  ;;  %260 = vadd.xlane.f32.xlu0 %v212_v35 }
  0x5c   : > { %266 = vadd.xlane.f32.xlu1 %v215_v38  ;;  %264 = vadd.xlane.f32.xlu0 %v214_v39 }
  0x60   : > { %270 = vadd.xlane.f32.xlu1 %v217_v42  ;;  %268 = vadd.xlane.f32.xlu0 %v216_v43 }
  0x64   : > { %274 = vadd.xlane.f32.xlu1 %v219_v46  ;;  %272 = vadd.xlane.f32.xlu0 %v218_v47 }
  0x68   : > { %278 = vadd.xlane.f32.xlu1 %v221_v50  ;;  %276 = vadd.xlane.f32.xlu0 %v220_v51 }
  0x6c   : > { %282 = vadd.xlane.f32.xlu1 %v223_v54  ;;  %280 = vadd.xlane.f32.xlu0 %v222_v55 }
  0x70   : > { %286 = vadd.xlane.f32.xlu1 %v225_v58  ;;  %284 = vadd.xlane.f32.xlu0 %v224_v59 }
  0x74   : > { %290 = vadd.xlane.f32.xlu1 %v227_v62  ;;  %288 = vadd.xlane.f32.xlu0 %v226_v63 }
  0xc1   : > { %v233_v3 = vpop.xlane.xlu1 %232  ;;  %v229_v4 = vpop.xlane.xlu0 %228 }
  0xc2   : > { %v295_v6 = vmul.f32 0.0078125, %v233_v3  ;;  %v293_v7 = vmul.f32 0.0078125, %v229_v4 }
  0xc4   : > { %902 = vrsqrt.f32 %v295_v6  ;;  %vm341_vm0 = vcmp.eq.f32.partialorder %v295_v6, inf  ;;  %vm343_vm1 = vcmp.eq.f32.partialorder %v295_v6, 0.0  ;;  %v344_v34 = vand.u32 2147483648, %v295_v6 }
  0xc5   : > { %904 = vrsqrt.f32 %v293_v7  ;;  %v235_v10 = vpop.xlane.xlu1 %234  ;;  %v231_v11 = vpop.xlane.xlu0 %230  ;;  %vm327_vm2 = vcmp.eq.f32.partialorder %v293_v7, inf  ;;  %vm329_vm3 = vcmp.eq.f32.partialorder %v293_v7, 0.0  ;;  %v330_v38 = vand.u32 2147483648, %v293_v7 }
  0xc6   : > { %v1402_v14 = vmul.f32 0.0078125, %v235_v10  ;;  %v1404_v15 = vmul.f32 0.0078125, %v231_v11 }
  0xc8   : > { %906 = vrsqrt.f32 %v1402_v14  ;;  %vm348_vm4 = vcmp.eq.f32.partialorder %v1402_v14, inf  ;;  %vm350_vm5 = vcmp.eq.f32.partialorder %v1402_v14, 0.0  ;;  %v351_v47 = vand.u32 2147483648, %v1402_v14 }
  0xc9   : > { %908 = vrsqrt.f32 %v1404_v15  ;;  %v239_v18 = vpop.xlane.xlu1 %238  ;;  %v237_v19 = vpop.xlane.xlu0 %236  ;;  %vm334_vm6 = vcmp.eq.f32.partialorder %v1404_v15, inf  ;;  %vm336_vm7 = vcmp.eq.f32.partialorder %v1404_v15, 0.0  ;;  %v337_v55 = vand.u32 2147483648, %v1404_v15 }
  0xca   : > { %v1408_v22 = vmul.f32 0.0078125, %v239_v18  ;;  %v1410_v23 = vmul.f32 0.0078125, %v237_v19 }
  0xcc   : > { %910 = vrsqrt.f32 %v1408_v22  ;;  %vm362_vm8 = vcmp.eq.f32.partialorder %v1408_v22, inf  ;;  %vm364_vm9 = vcmp.eq.f32.partialorder %v1408_v22, 0.0  ;;  %v365_v60 = vand.u32 2147483648, %v1408_v22 }
  0xcd   : > { %912 = vrsqrt.f32 %v1410_v23  ;;  %v243_v26 = vpop.xlane.xlu1 %242  ;;  %v241_v27 = vpop.xlane.xlu0 %240  ;;  %vm355_vm10 = vcmp.eq.f32.partialorder %v1410_v23, inf  ;;  %vm357_vm11 = vcmp.eq.f32.partialorder %v1410_v23, 0.0  ;;  %v358_v18 = vand.u32 2147483648, %v1410_v23 }
  0xce   : > { %v1414_v30 = vmul.f32 0.0078125, %v243_v26  ;;  %v1416_v31 = vmul.f32 0.0078125, %v241_v27 }
  0xd0   : > { %914 = vrsqrt.f32 %v1414_v30  ;;  %vm376_vm12 = vcmp.eq.f32.partialorder %v1414_v30, inf  ;;  %vm378_vm13 = vcmp.eq.f32.partialorder %v1414_v30, 0.0  ;;  %vm369_vm14 = vcmp.eq.f32.partialorder %v1416_v31, inf }
  0xd1   : > { %v903_v35 = vpop.eup %902  ;;  %916 = vrsqrt.f32 %v1416_v31  ;;  %v247_v39 = vpop.xlane.xlu1 %246  ;;  %vm371_vm15 = vcmp.eq.f32.partialorder %v1416_v31, 0.0 }
  0xd2   : > { %v245_v42 = vpop.xlane.xlu0 %244  ;;  %v905_v43 = vpop.eup %904  ;;  %v340_v46 = vmul.f32 %v903_v35, %v295_v6  ;;  %v1423_v50 = vmul.f32 0.0078125, %v247_v39 }
  0xd3   : > { %v1425_v51 = vmul.f32 0.0078125, %v245_v42  ;;  %v326_v54 = vmul.f32 %v905_v43, %v293_v7 }
  0xd4   : > { %v342_v56 = vsel %vm341_vm0, %v295_v6, %v340_v46  ;;  %918 = vrsqrt.f32 %v1423_v50  ;;  %vm390_vm0 = vcmp.eq.f32.partialorder %v1423_v50, inf }
  0xd5   : > { %v907_v57 = vpop.eup %906  ;;  %v345_v58 = vsel %vm343_vm1, %v344_v34, %v342_v56  ;;  %v328_v59 = vsel %vm327_vm2, %v293_v7, %v326_v54  ;;  %920 = vrsqrt.f32 %v1425_v51  ;;  %v251_v61 = vpop.xlane.xlu1 %250  ;;  %vm392_vm1 = vcmp.eq.f32.partialorder %v1423_v50, 0.0 }
  0xd6   : > { %v249_v62 = vpop.xlane.xlu0 %248  ;;  %v909_v63 = vpop.eup %908  ;;  %v551_v3 = vadd.f32 1e-08, %v345_v58  ;;  %v331_v4 = vsel %vm329_vm3, %v330_v38, %v328_v59  ;;  %v347_v10 = vmul.f32 %v907_v57, %v1402_v14  ;;  %v1448_v7 = vmul.f32 0.0078125, %v251_v61 }
  0xd7   : > { %v549_v11 = vadd.f32 1e-08, %v331_v4  ;;  %v333_v6 = vmul.f32 %v909_v63, %v1404_v15  ;;  %v1455_v35 = vmul.f32 0.0078125, %v249_v62  ;;  %v372_v59 = vand.u32 2147483648, %v1416_v31 }
  0xd8   : > { %922 = vrcp.f32 %v551_v3  ;;  %v349_v19 = vsel %vm348_vm4, %v1402_v14, %v347_v10  ;;  %vm383_vm2 = vcmp.eq.f32.partialorder %v1425_v51, inf  ;;  %vm385_vm3 = vcmp.eq.f32.partialorder %v1425_v51, 0.0 }
  0xd9   : > { %v911_v26 = vpop.eup %910  ;;  %924 = vrcp.f32 %v549_v11  ;;  %v352_v27 = vsel %vm350_vm5, %v351_v47, %v349_v19  ;;  %v335_v34 = vsel %vm334_vm6, %v1404_v15, %v333_v6  ;;  %v255_v46 = vpop.xlane.xlu1 %254  ;;  %v379_v47 = vand.u32 2147483648, %v1414_v30 }
  0xda   : > { %v913_v38 = vpop.eup %912  ;;  %v552_v39 = vadd.f32 1e-08, %v352_v27  ;;  %v338_v42 = vsel %vm336_vm7, %v337_v55, %v335_v34  ;;  %v361_v43 = vmul.f32 %v911_v26, %v1408_v22  ;;  %926 = vrsqrt.f32 %v1448_v7  ;;  %v253_v56 = vpop.xlane.xlu0 %252 }
  0xdb   : > { %v550_v54 = vadd.f32 1e-08, %v338_v42  ;;  %v354_v14 = vmul.f32 %v913_v38, %v1410_v23  ;;  %v1493_v26 = vmul.f32 0.0078125, %v253_v56  ;;  %vm404_vm4 = vcmp.eq.f32.partialorder %v1448_v7, inf }
  0xdc   : > { %928 = vrcp.f32 %v552_v39  ;;  %v363_v57 = vsel %vm362_vm8, %v1408_v22, %v361_v43  ;;  %v1481_v22 = vmul.f32 0.0078125, %v255_v46  ;;  %vm406_vm5 = vcmp.eq.f32.partialorder %v1448_v7, 0.0 }
  0xdd   : > { %v915_v15 = vpop.eup %914  ;;  %930 = vrcp.f32 %v550_v54  ;;  %v366_v55 = vsel %vm364_vm9, %v365_v60, %v363_v57  ;;  %v356_v58 = vsel %vm355_vm10, %v1410_v23, %v354_v14  ;;  %v393_v23 = vand.u32 2147483648, %v1423_v50  ;;  %v259_v11 = vpop.xlane.xlu1 %258 }
  0xde   : > { %v917_v61 = vpop.eup %916  ;;  %v554_v62 = vadd.f32 1e-08, %v366_v55  ;;  %v359_v63 = vsel %vm357_vm11, %v358_v18, %v356_v58  ;;  %v375_v3 = vmul.f32 %v915_v15, %v1414_v30  ;;  %932 = vrsqrt.f32 %v1455_v35  ;;  %v257_v27 = vpop.xlane.xlu0 %256 }
  0xdf   : > { %v553_v4 = vadd.f32 1e-08, %v359_v63  ;;  %v368_v10 = vmul.f32 %v917_v61, %v1416_v31  ;;  %v1501_v46 = vmul.f32 0.0078125, %v259_v11  ;;  %vm397_vm6 = vcmp.eq.f32.partialorder %v1455_v35, inf }
  0xe0   : > { %934 = vrcp.f32 %v554_v62  ;;  %v377_v60 = vsel %vm376_vm12, %v1414_v30, %v375_v3  ;;  %vm399_vm7 = vcmp.eq.f32.partialorder %v1455_v35, 0.0  ;;  %vm418_vm8 = vcmp.eq.f32.partialorder %v1481_v22, inf }
  0xe1   : > { %v919_v6 = vpop.eup %918  ;;  %936 = vrcp.f32 %v553_v4  ;;  %v380_v18 = vsel %vm378_vm13, %v379_v47, %v377_v60  ;;  %v370_v19 = vsel %vm369_vm14, %v1416_v31, %v368_v10  ;;  %v386_v31 = vand.u32 2147483648, %v1425_v51  ;;  %v1511_v47 = vld [vmem:[%s1886_s1] ss:$0 sm:$0xff]  ;;  %v263_v61 = vpop.xlane.xlu1 %262 }
  0xe2   : > { %v921_v34 = vpop.eup %920  ;;  %v556_v38 = vadd.f32 1e-08, %v380_v18  ;;  %v373_v39 = vsel %vm371_vm15, %v372_v59, %v370_v19  ;;  %v389_v42 = vmul.f32 %v919_v6, %v1423_v50  ;;  %938 = vrsqrt.f32 %v1481_v22 }
  0xe3   : > { %v555_v43 = vadd.f32 1e-08, %v373_v39  ;;  %v382_v30 = vmul.f32 %v921_v34, %v1425_v51  ;;  %v407_v4 = vand.u32 2147483648, %v1448_v7  ;;  %v1539_v18 = vmul.f32 0.0078125, %v263_v61 }
  0xe4   : > { %940 = vrcp.f32 %v556_v38  ;;  %v391_v54 = vsel %vm390_vm0, %v1423_v50, %v389_v42  ;;  %v261_v50 = vpop.xlane.xlu0 %260  ;;  %vm420_vm9 = vcmp.eq.f32.partialorder %v1481_v22, 0.0  ;;  %vm411_vm10 = vcmp.eq.f32.partialorder %v1493_v26, inf }
  0xe5   : > { %v923_v14 = vpop.eup %922  ;;  %942 = vrcp.f32 %v555_v43  ;;  %v394_v56 = vsel %vm392_vm1, %v393_v23, %v391_v54  ;;  %v384_v57 = vsel %vm383_vm2, %v1425_v51, %v382_v30  ;;  %v1546_v38 = vmul.f32 0.0078125, %v261_v50  ;;  %v267_v30 = vpop.xlane.xlu1 %266 }
  0xe6   : > { %v925_v15 = vpop.eup %924  ;;  %v648_v55 = vmul.f32 %v923_v14, %v1259_v0  ;;  %v558_v58 = vadd.f32 1e-08, %v394_v56  ;;  %v387_v59 = vsel %vm385_vm3, %v386_v31, %v384_v57  ;;  %944 = vrsqrt.f32 %v1493_v26 }
  0xe7   : > { %v927_v62 = vpop.eup %926  ;;  %v646_v63 = vmul.f32 %v925_v15, %v1262_v1  ;;  %v557_v3 = vadd.f32 1e-08, %v387_v59  ;;  %946 = vrsqrt.f32 %v1501_v46  ;;  %v1527_v1 = vmul.f32 0.0078125, %v257_v27 }
  0xe8   : > { %v686_v51 = vmul.f32 %v1511_v47, %v648_v55  ;;  %948 = vrcp.f32 %v558_v58  ;;  %v403_v0 = vmul.f32 %v927_v62, %v1448_v7  ;;  %v400_v43 = vand.u32 2147483648, %v1455_v35 }
  0xe9   : > { %v929_v10 = vpop.eup %928  ;;  %v684_v60 = vmul.f32 %v1511_v47, %v646_v63  ;;  %950 = vrcp.f32 %v557_v3  ;;  %v421_v57 = vand.u32 2147483648, %v1481_v22  ;;  %vm413_vm11 = vcmp.eq.f32.partialorder %v1493_v26, 0.0 }
  0xea   : > { %v931_v23 = vpop.eup %930  ;;  %718 = vst [vmem:[%s1531_s30 + $0x10] sm:$0xff] %v686_v51  ;;  %v649_v11 = vmul.f32 %v929_v10, %v1265_v2  ;;  %v405_v6 = vsel %vm404_vm4, %v1448_v7, %v403_v0  ;;  %952 = vrsqrt.f32 %v1527_v1  ;;  %v265_v7 = vpop.xlane.xlu0 %264  ;;  %vm432_vm12 = vcmp.eq.f32.partialorder %v1501_v46, inf }
  0xeb   : > { %v933_v19 = vpop.eup %932  ;;  %716 = vst [vmem:[%s1531_s30] sm:$0xff] %v684_v60  ;;  %v647_v27 = vmul.f32 %v931_v23, %v1272_v5  ;;  %v408_v34 = vsel %vm406_vm5, %v407_v4, %v405_v6  ;;  %954 = vrsqrt.f32 %v1539_v18  ;;  %v1580_v0 = vmul.f32 0.0078125, %v265_v7  ;;  %v271_v4 = vpop.xlane.xlu1 %270 }
  0xec   : > { %v687_v2 = vmul.f32 %v1511_v47, %v649_v11  ;;  %v560_v39 = vadd.f32 1e-08, %v408_v34  ;;  %v396_v42 = vmul.f32 %v933_v19, %v1455_v35  ;;  %vm434_vm13 = vcmp.eq.f32.partialorder %v1501_v46, 0.0 }
  0xed   : > { %v935_v54 = vpop.eup %934  ;;  %v685_v5 = vmul.f32 %v1511_v47, %v647_v27  ;;  %v435_v34 = vand.u32 2147483648, %v1501_v46  ;;  %vm425_vm14 = vcmp.eq.f32.partialorder %v1527_v1, inf  ;;  %vm427_vm15 = vcmp.eq.f32.partialorder %v1527_v1, 0.0 }
  0xee   : > { %v937_v31 = vpop.eup %936  ;;  %719 = vst [vmem:[%s1531_s30 + $0x18] sm:$0xff] %v687_v2  ;;  %v651_v14 = vmul.f32 %v935_v54, %v1279_v8  ;;  %956 = vrcp.f32 %v560_v39  ;;  %v398_v56 = vsel %vm397_vm6, %v1455_v35, %v396_v42  ;;  %v1573_v35 = vmul.f32 0.0078125, %v267_v30 }
  0xef   : > { %v939_v15 = vpop.eup %938  ;;  %717 = vst [vmem:[%s1531_s30 + $0x8] sm:$0xff] %v685_v5  ;;  %v650_v55 = vmul.f32 %v937_v31, %v1282_v9  ;;  %v401_v58 = vsel %vm399_vm7, %v400_v43, %v398_v56  ;;  %958 = vrsqrt.f32 %v1546_v38  ;;  %v414_v9 = vand.u32 2147483648, %v1493_v26 }
  0xf0   : > { %v689_v8 = vmul.f32 %v1511_v47, %v651_v14  ;;  %v559_v59 = vadd.f32 1e-08, %v401_v58  ;;  %v417_v61 = vmul.f32 %v939_v15, %v1481_v22  ;;  %vm446_vm0 = vcmp.eq.f32.partialorder %v1539_v18, inf }
  0xf1   : > { %v941_v62 = vpop.eup %940  ;;  %v688_v63 = vmul.f32 %v1511_v47, %v650_v55  ;;  %v1615_v55 = vmul.f32 0.0078125, %v271_v4  ;;  %vm448_vm1 = vcmp.eq.f32.partialorder %v1539_v18, 0.0  ;;  %vm439_vm2 = vcmp.eq.f32.partialorder %v1546_v38, inf }
  0xf2   : > { %v943_v3 = vpop.eup %942  ;;  %721 = vst [vmem:[%s1531_s30 + $0x28] sm:$0xff] %v689_v8  ;;  %v653_v50 = vmul.f32 %v941_v62, %v1289_v12  ;;  %960 = vrcp.f32 %v559_v59  ;;  %v419_v51 = vsel %vm418_vm8, %v1481_v22, %v417_v61  ;;  %v269_v12 = vpop.xlane.xlu0 %268  ;;  %vm441_vm3 = vcmp.eq.f32.partialorder %v1546_v38, 0.0 }
  0xf3   : > { %v945_v10 = vpop.eup %944  ;;  %720 = vst [vmem:[%s1531_s30 + $0x20] sm:$0xff] %v688_v63  ;;  %v652_v60 = vmul.f32 %v943_v3, %v1292_v13  ;;  %v422_v23 = vsel %vm420_vm9, %v421_v57, %v419_v51  ;;  %962 = vrsqrt.f32 %v1573_v35  ;;  %v1620_v59 = vmul.f32 0.0078125, %v269_v12 }
  0xf4   : > { %v947_v11 = vpop.eup %946  ;;  %v691_v6 = vmul.f32 %v1511_v47, %v653_v50  ;;  %v562_v19 = vadd.f32 1e-08, %v422_v23  ;;  %v410_v27 = vmul.f32 %v945_v10, %v1493_v26  ;;  %964 = vrsqrt.f32 %v1580_v0 }
  0xf5   : > { %v949_v2 = vpop.eup %948  ;;  %v690_v13 = vmul.f32 %v1511_v47, %v652_v60  ;;  %v431_v22 = vmul.f32 %v947_v11, %v1501_v46  ;;  %v442_v23 = vand.u32 2147483648, %v1546_v38  ;;  %vm460_vm4 = vcmp.eq.f32.partialorder %v1573_v35, inf }
  0xf6   : > { %v951_v39 = vpop.eup %950  ;;  %723 = vst [vmem:[%s1531_s30 + $0x38] sm:$0xff] %v691_v6  ;;  %v655_v42 = vmul.f32 %v949_v2, %v1299_v16  ;;  %966 = vrcp.f32 %v562_v19  ;;  %v412_v43 = vsel %vm411_vm10, %v1493_v26, %v410_v27  ;;  %v428_v16 = vand.u32 2147483648, %v1527_v1  ;;  %v273_v58 = vpop.xlane.xlu0 %272 }
  0xf7   : > { %722 = vst [vmem:[%s1531_s30 + $0x30] sm:$0xff] %v690_v13  ;;  %v654_v30 = vmul.f32 %v951_v39, %v1302_v17  ;;  %v415_v54 = vsel %vm413_vm11, %v414_v9, %v412_v43  ;;  %v433_v5 = vsel %vm432_vm12, %v1501_v46, %v431_v22  ;;  %v953_v7 = vpop.eup %952  ;;  %v275_v17 = vpop.xlane.xlu1 %274  ;;  %v449_v46 = vand.u32 2147483648, %v1539_v18 }
  0xf8   : > { %v693_v31 = vmul.f32 %v1511_v47, %v655_v42  ;;  %v561_v14 = vadd.f32 1e-08, %v415_v54  ;;  %v436_v56 = vsel %vm434_vm13, %v435_v34, %v433_v5  ;;  %v424_v15 = vmul.f32 %v953_v7, %v1527_v1  ;;  %v955_v8 = vpop.eup %954 }
  0xf9   : > { %v692_v26 = vmul.f32 %v1511_v47, %v654_v30  ;;  %v564_v57 = vadd.f32 1e-08, %v436_v56  ;;  %v445_v63 = vmul.f32 %v955_v8, %v1539_v18  ;;  %v1632_v51 = vmul.f32 0.0078125, %v275_v17 }
  0xfa   : > { %725 = vst [vmem:[%s1531_s30 + $0x48] sm:$0xff] %v693_v31  ;;  %968 = vrcp.f32 %v561_v14  ;;  %v426_v62 = vsel %vm425_vm14, %v1527_v1, %v424_v15  ;;  %v1643_v1 = vmul.f32 0.0078125, %v273_v58  ;;  %v277_v34 = vpop.xlane.xlu0 %276  ;;  %vm462_vm5 = vcmp.eq.f32.partialorder %v1573_v35, 0.0 }
  0xfb   : > { %v957_v61 = vpop.eup %956  ;;  %724 = vst [vmem:[%s1531_s30 + $0x40] sm:$0xff] %v692_v26  ;;  %970 = vrcp.f32 %v564_v57  ;;  %v429_v50 = vsel %vm427_vm15, %v428_v16, %v426_v62  ;;  %v447_v10 = vsel %vm446_vm0, %v1539_v18, %v445_v63  ;;  %v279_v11 = vpop.xlane.xlu1 %278  ;;  %vm453_vm6 = vcmp.eq.f32.partialorder %v1580_v0, inf }
  0xfc   : > { %v959_v9 = vpop.eup %958  ;;  %v657_v3 = vmul.f32 %v957_v61, %v1309_v20  ;;  %972 = vrsqrt.f32 %v1615_v55  ;;  %v563_v4 = vadd.f32 1e-08, %v429_v50  ;;  %v450_v20 = vsel %vm448_vm1, %v449_v46, %v447_v10 }
  0xfd   : > { %v438_v60 = vmul.f32 %v959_v9, %v1546_v38  ;;  %974 = vrsqrt.f32 %v1620_v59  ;;  %v566_v19 = vadd.f32 1e-08, %v450_v20  ;;  %v456_v7 = vand.u32 2147483648, %v1580_v0 }
  0xfe   : > { %v695_v12 = vmul.f32 %v1511_v47, %v657_v3  ;;  %976 = vrcp.f32 %v563_v4  ;;  %vm455_vm7 = vcmp.eq.f32.partialorder %v1580_v0, 0.0  ;;  %v1666_v17 = vmul.f32 0.0078125, %v279_v11 }
  0xff   : > { %v961_v6 = vpop.eup %960  ;;  %v440_v27 = vsel %vm439_vm2, %v1546_v38, %v438_v60  ;;  %978 = vrsqrt.f32 %v1632_v51  ;;  %v463_v38 = vand.u32 2147483648, %v1573_v35  ;;  %v283_v31 = vpop.xlane.xlu1 %282  ;;  %vm474_vm8 = vcmp.eq.f32.partialorder %v1615_v55, inf }
 0x100   : > { %v963_v2 = vpop.eup %962  ;;  %727 = vst [vmem:[%s1531_s30 + $0x58] sm:$0xff] %v695_v12  ;;  %v656_v18 = vmul.f32 %v961_v6, %v1312_v21  ;;  %v443_v13 = vsel %vm441_vm3, %v442_v23, %v440_v27  ;;  %980 = vrcp.f32 %v566_v19  ;;  %vm476_vm9 = vcmp.eq.f32.partialorder %v1615_v55, 0.0 }
 0x101   : > { %v565_v22 = vadd.f32 1e-08, %v443_v13  ;;  %v459_v39 = vmul.f32 %v963_v2, %v1573_v35  ;;  %v965_v42 = vpop.eup %964  ;;  %982 = vrsqrt.f32 %v1643_v1  ;;  %v1673_v8 = vmul.f32 0.0078125, %v283_v31 }
 0x102   : > { %v694_v43 = vmul.f32 %v1511_v47, %v656_v18  ;;  %v452_v54 = vmul.f32 %v965_v42, %v1580_v0  ;;  %v477_v61 = vand.u32 2147483648, %v1615_v55  ;;  %vm467_vm10 = vcmp.eq.f32.partialorder %v1620_v59, inf }
 0x103   : > { %v967_v30 = vpop.eup %966  ;;  %984 = vrcp.f32 %v565_v22  ;;  %v461_v21 = vsel %vm460_vm4, %v1573_v35, %v459_v39  ;;  %v281_v35 = vpop.xlane.xlu0 %280  ;;  %vm469_vm11 = vcmp.eq.f32.partialorder %v1620_v59, 0.0  ;;  %vm488_vm12 = vcmp.eq.f32.partialorder %v1632_v51, inf }
 0x104   : > { %726 = vst [vmem:[%s1531_s30 + $0x50] sm:$0xff] %v694_v43  ;;  %v659_v5 = vmul.f32 %v967_v30, %v1319_v24  ;;  %v464_v16 = vsel %vm462_vm5, %v463_v38, %v461_v21  ;;  %v454_v56 = vsel %vm453_vm6, %v1580_v0, %v452_v54  ;;  %v1670_v24 = vmul.f32 0.0078125, %v277_v34 }
 0x105   : > { %v568_v14 = vadd.f32 1e-08, %v464_v16  ;;  %v457_v57 = vsel %vm455_vm7, %v456_v7, %v454_v56  ;;  %v1679_v62 = vmul.f32 0.0078125, %v281_v35  ;;  %vm490_vm13 = vcmp.eq.f32.partialorder %v1632_v51, 0.0 }
 0x106   : > { %v697_v26 = vmul.f32 %v1511_v47, %v659_v5  ;;  %v567_v58 = vadd.f32 1e-08, %v457_v57  ;;  %v491_v20 = vand.u32 2147483648, %v1632_v51  ;;  %vm481_vm14 = vcmp.eq.f32.partialorder %v1643_v1, inf }
 0x107   : > { %v969_v15 = vpop.eup %968  ;;  %986 = vrcp.f32 %v568_v14  ;;  %v285_v11 = vpop.xlane.xlu0 %284  ;;  %v484_v34 = vand.u32 2147483648, %v1643_v1  ;;  %vm483_vm15 = vcmp.eq.f32.partialorder %v1643_v1, 0.0  ;;  %vm502_vm0 = vcmp.eq.f32.partialorder %v1666_v17, inf }
 0x108   : > { %v971_v46 = vpop.eup %970  ;;  %729 = vst [vmem:[%s1531_s30 + $0x68] sm:$0xff] %v697_v26  ;;  %v658_v0 = vmul.f32 %v969_v15, %v1322_v25  ;;  %988 = vrsqrt.f32 %v1666_v17  ;;  %v470_v25 = vand.u32 2147483648, %v1620_v59  ;;  %v1715_v38 = vmul.f32 0.0078125, %v285_v11 }
 0x109   : > { %v973_v63 = vpop.eup %972  ;;  %v661_v9 = vmul.f32 %v971_v46, %v1329_v28  ;;  %990 = vrcp.f32 %v567_v58  ;;  %v287_v28 = vpop.xlane.xlu1 %286  ;;  %vm504_vm1 = vcmp.eq.f32.partialorder %v1666_v17, 0.0  ;;  %v505_v57 = vand.u32 2147483648, %v1666_v17 }
 0x10a   : > { %v696_v3 = vmul.f32 %v1511_v47, %v658_v0  ;;  %v473_v50 = vmul.f32 %v973_v63, %v1615_v55  ;;  %992 = vrsqrt.f32 %v1670_v24  ;;  %v975_v4 = vpop.eup %974  ;;  %v1709_v39 = vmul.f32 0.0078125, %v287_v28 }
 0x10b   : > { %v699_v10 = vmul.f32 %v1511_v47, %v661_v9  ;;  %994 = vrsqrt.f32 %v1673_v8  ;;  %v977_v60 = vpop.eup %976  ;;  %v466_v12 = vmul.f32 %v975_v4, %v1620_v59  ;;  %vm495_vm2 = vcmp.eq.f32.partialorder %v1670_v24, inf }
 0x10c   : > { %728 = vst [vmem:[%s1531_s30 + $0x60] sm:$0xff] %v696_v3  ;;  %v475_v23 = vsel %vm474_vm8, %v1615_v55, %v473_v50  ;;  %996 = vrsqrt.f32 %v1679_v62  ;;  %v979_v6 = vpop.eup %978  ;;  %v660_v19 = vmul.f32 %v977_v60, %v1332_v29  ;;  %vm497_vm3 = vcmp.eq.f32.partialorder %v1670_v24, 0.0 }
 0x10d   : > { %731 = vst [vmem:[%s1531_s30 + $0x78] sm:$0xff] %v699_v10  ;;  %v478_v27 = vsel %vm476_vm9, %v477_v61, %v475_v23  ;;  %v981_v2 = vpop.eup %980  ;;  %v468_v13 = vsel %vm467_vm10, %v1620_v59, %v466_v12  ;;  %v487_v22 = vmul.f32 %v979_v6, %v1632_v51  ;;  %v291_v14 = vpop.xlane.xlu1 %290  ;;  %v498_v61 = vand.u32 2147483648, %v1670_v24 }
 0x10e   : > { %v570_v18 = vadd.f32 1e-08, %v478_v27  ;;  %v983_v42 = vpop.eup %982  ;;  %v698_v29 = vmul.f32 %v1511_v47, %v660_v19  ;;  %v663_v55 = vmul.f32 %v981_v2, %v1339_v32  ;;  %v471_v43 = vsel %vm469_vm11, %v470_v25, %v468_v13 }
 0x10f   : > { %v569_v21 = vadd.f32 1e-08, %v471_v43  ;;  %v489_v54 = vsel %vm488_vm12, %v1632_v51, %v487_v22  ;;  %v480_v5 = vmul.f32 %v983_v42, %v1643_v1  ;;  %v1741_v58 = vmul.f32 0.0078125, %v291_v14 }
 0x110   : > { %v985_v30 = vpop.eup %984  ;;  %998 = vrcp.f32 %v570_v18  ;;  %730 = vst [vmem:[%s1531_s30 + $0x70] sm:$0xff] %v698_v29  ;;  %v701_v16 = vmul.f32 %v1511_v47, %v663_v55  ;;  %v492_v59 = vsel %vm490_vm13, %v491_v20, %v489_v54  ;;  %vm516_vm4 = vcmp.eq.f32.partialorder %v1673_v8, inf }
 0x111   : > { %v662_v32 = vmul.f32 %v985_v30, %v1342_v33  ;;  %1000 = vrsqrt.f32 %v1709_v39  ;;  %v572_v7 = vadd.f32 1e-08, %v492_v59  ;;  %v482_v31 = vsel %vm481_vm14, %v1643_v1, %v480_v5  ;;  %v289_v33 = vpop.xlane.xlu0 %288 }
 0x112   : > { %1002 = vrcp.f32 %v569_v21  ;;  %733 = vst [vmem:[%s1531_s30 + $0x88] sm:$0xff] %v701_v16  ;;  %v485_v35 = vsel %vm483_vm15, %v484_v34, %v482_v31  ;;  %v1745_v63 = vmul.f32 0.0078125, %v289_v33  ;;  %vm518_vm5 = vcmp.eq.f32.partialorder %v1673_v8, 0.0 }
 0x113   : > { %v700_v56 = vmul.f32 %v1511_v47, %v662_v32  ;;  %1004 = vrcp.f32 %v572_v7  ;;  %v571_v26 = vadd.f32 1e-08, %v485_v35  ;;  %v519_v10 = vand.u32 2147483648, %v1673_v8 }
 0x114   : > { %v987_v51 = vpop.eup %986  ;;  %1006 = vrsqrt.f32 %v1715_v38  ;;  %vm509_vm6 = vcmp.eq.f32.partialorder %v1679_v62, inf  ;;  %vm511_vm7 = vcmp.eq.f32.partialorder %v1679_v62, 0.0  ;;  %v512_v19 = vand.u32 2147483648, %v1679_v62 }
 0x115   : > { %v989_v15 = vpop.eup %988  ;;  %732 = vst [vmem:[%s1531_s30 + $0x80] sm:$0xff] %v700_v56  ;;  %v665_v1 = vmul.f32 %v987_v51, %v1349_v36  ;;  %1008 = vrcp.f32 %v571_v26  ;;  %vm530_vm8 = vcmp.eq.f32.partialorder %v1709_v39, inf  ;;  %v533_v30 = vand.u32 2147483648, %v1709_v39 }
 0x116   : > { %v991_v46 = vpop.eup %990  ;;  %v501_v0 = vmul.f32 %v989_v15, %v1666_v17  ;;  %1010 = vrsqrt.f32 %v1741_v58  ;;  %vm532_vm9 = vcmp.eq.f32.partialorder %v1709_v39, 0.0  ;;  %vm523_vm10 = vcmp.eq.f32.partialorder %v1715_v38, inf }
 0x117   : > { %v993_v9 = vpop.eup %992  ;;  %v703_v3 = vmul.f32 %v1511_v47, %v665_v1  ;;  %v664_v36 = vmul.f32 %v991_v46, %v1352_v37  ;;  %1012 = vrsqrt.f32 %v1745_v63  ;;  %vm525_vm11 = vcmp.eq.f32.partialorder %v1715_v38, 0.0 }
 0x118   : > { %v995_v50 = vpop.eup %994  ;;  %v503_v25 = vsel %vm502_vm0, %v1666_v17, %v501_v0  ;;  %v494_v4 = vmul.f32 %v993_v9, %v1670_v24  ;;  %vm544_vm12 = vcmp.eq.f32.partialorder %v1741_v58, inf  ;;  %vm546_vm13 = vcmp.eq.f32.partialorder %v1741_v58, 0.0 }
 0x119   : > { %v997_v28 = vpop.eup %996  ;;  %735 = vst [vmem:[%s1531_s30 + $0x98] sm:$0xff] %v703_v3  ;;  %v702_v37 = vmul.f32 %v1511_v47, %v664_v36  ;;  %v506_v60 = vsel %vm504_vm1, %v505_v57, %v503_v25  ;;  %v515_v23 = vmul.f32 %v995_v50, %v1673_v8  ;;  %vm537_vm14 = vcmp.eq.f32.partialorder %v1745_v63, inf }
 0x11a   : > { %v574_v12 = vadd.f32 1e-08, %v506_v60  ;;  %v496_v20 = vsel %vm495_vm2, %v1670_v24, %v494_v4  ;;  %v508_v11 = vmul.f32 %v997_v28, %v1679_v62  ;;  %v540_v46 = vand.u32 2147483648, %v1745_v63 }
 0x11b   : > { %734 = vst [vmem:[%s1531_s30 + $0x90] sm:$0xff] %v702_v37  ;;  %v499_v6 = vsel %vm497_vm3, %v498_v61, %v496_v20  ;;  %v517_v17 = vsel %vm516_vm4, %v1673_v8, %v515_v23  ;;  %vm539_vm15 = vcmp.eq.f32.partialorder %v1745_v63, 0.0 }
 0x11c   : > { %1014 = vrcp.f32 %v574_v12  ;;  %v573_v27 = vadd.f32 1e-08, %v499_v6  ;;  %v520_v34 = vsel %vm518_vm5, %v519_v10, %v517_v17  ;;  %v510_v2 = vsel %vm509_vm6, %v1679_v62, %v508_v11 }
 0x11d   : > { %v999_v18 = vpop.eup %998  ;;  %v576_v13 = vadd.f32 1e-08, %v520_v34  ;;  %v513_v22 = vsel %vm511_vm7, %v512_v19, %v510_v2 }
 0x11e   : > { %v1001_v24 = vpop.eup %1000  ;;  %v667_v42 = vmul.f32 %v999_v18, %v1359_v40  ;;  %1016 = vrcp.f32 %v573_v27  ;;  %v575_v29 = vadd.f32 1e-08, %v513_v22  ;;  %v1032_v27 = vld [vmem:[%s1252_s6 + $0xf8] sm:$0xff] }
 0x11f   : > { %v1003_v55 = vpop.eup %1002  ;;  %1018 = vrcp.f32 %v576_v13  ;;  %v529_v43 = vmul.f32 %v1001_v24, %v1709_v39  ;;  %v1033_v13 = vld [vmem:[%s1252_s6 + $0xf0] sm:$0xff] }
 0x120   : > { %v705_v8 = vmul.f32 %v1511_v47, %v667_v42  ;;  %v666_v62 = vmul.f32 %v1003_v55, %v1362_v41  ;;  %1020 = vrcp.f32 %v575_v29  ;;  %v1005_v21 = vpop.eup %1004 }
 0x121   : > { %v531_v54 = vsel %vm530_vm8, %v1709_v39, %v529_v43  ;;  %v1007_v40 = vpop.eup %1006  ;;  %v669_v16 = vmul.f32 %v1005_v21, %v1369_v44  ;;  %v526_v39 = vand.u32 2147483648, %v1715_v38 }
 0x122   : > { %737 = vst [vmem:[%s1531_s30 + $0xa8] sm:$0xff] %v705_v8  ;;  %v704_v5 = vmul.f32 %v1511_v47, %v666_v62  ;;  %v534_v32 = vsel %vm532_vm9, %v533_v30, %v531_v54  ;;  %v1009_v59 = vpop.eup %1008  ;;  %v522_v41 = vmul.f32 %v1007_v40, %v1715_v38 }
 0x123   : > { %v578_v7 = vadd.f32 1e-08, %v534_v32  ;;  %v1011_v31 = vpop.eup %1010  ;;  %v707_v14 = vmul.f32 %v1511_v47, %v669_v16  ;;  %v668_v56 = vmul.f32 %v1009_v59, %v1372_v45  ;;  %v547_v45 = vand.u32 2147483648, %v1741_v58 }
 0x124   : > { %736 = vst [vmem:[%s1531_s30 + $0xa0] sm:$0xff] %v704_v5  ;;  %v524_v44 = vsel %vm523_vm10, %v1715_v38, %v522_v41  ;;  %v543_v35 = vmul.f32 %v1011_v31, %v1741_v58  ;;  %v1013_v33 = vpop.eup %1012 }
 0x125   : > { %1022 = vrcp.f32 %v578_v7  ;;  %739 = vst [vmem:[%s1531_s30 + $0xb8] sm:$0xff] %v707_v14  ;;  %v706_v51 = vmul.f32 %v1511_v47, %v668_v56  ;;  %v527_v26 = vsel %vm525_vm11, %v526_v39, %v524_v44  ;;  %v536_v1 = vmul.f32 %v1013_v33, %v1745_v63 }
 0x126   : > { %v577_v57 = vadd.f32 1e-08, %v527_v26  ;;  %v545_v15 = vsel %vm544_vm12, %v1741_v58, %v543_v35 }
 0x127   : > { %738 = vst [vmem:[%s1531_s30 + $0xb0] sm:$0xff] %v706_v51  ;;  %v548_v38 = vsel %vm546_vm13, %v547_v45, %v545_v15  ;;  %v538_v9 = vsel %vm537_vm14, %v1745_v63, %v536_v1 }
 0x128   : > { %1024 = vrcp.f32 %v577_v57  ;;  %v580_v61 = vadd.f32 1e-08, %v548_v38  ;;  %v541_v58 = vsel %vm539_vm15, %v540_v46, %v538_v9 }
 0x129   : > { %v1015_v0 = vpop.eup %1014  ;;  %v579_v50 = vadd.f32 1e-08, %v541_v58 }
 0x12a   : > { %v671_v3 = vmul.f32 %v1015_v0, %v1379_v48  ;;  %1026 = vrcp.f32 %v580_v61 }
 0x12b   : > { %v1017_v36 = vpop.eup %1016  ;;  %1028 = vrcp.f32 %v579_v50 }
 0x12c   : > { %v1019_v25 = vpop.eup %1018  ;;  %v709_v4 = vmul.f32 %v1511_v47, %v671_v3  ;;  %v670_v10 = vmul.f32 %v1017_v36, %v1382_v49 }
 0x12d   : > { %v1021_v28 = vpop.eup %1020  ;;  %v673_v37 = vmul.f32 %v1019_v25, %v1389_v52  ;;  %v1030_v52 = vld [vmem:[%s1252_s6 + $0xe8] sm:$0xff] }
 0x12e   : > { %741 = vst [vmem:[%s1531_s30 + $0xc8] sm:$0xff] %v709_v4  ;;  %v708_v48 = vmul.f32 %v1511_v47, %v670_v10  ;;  %v672_v63 = vmul.f32 %v1021_v28, %v1392_v53  ;;  %v1031_v53 = vld [vmem:[%s1252_s6 + $0xe0] sm:$0xff] }
 0x12f   : > { %v711_v60 = vmul.f32 %v1511_v47, %v673_v37 }
 0x130   : > { %740 = vst [vmem:[%s1531_s30 + $0xc0] sm:$0xff] %v708_v48  ;;  %v710_v23 = vmul.f32 %v1511_v47, %v672_v63 }
 0x131   : > { %743 = vst [vmem:[%s1531_s30 + $0xd8] sm:$0xff] %v711_v60 }
 0x132   : > { %v1023_v49 = vpop.eup %1022  ;;  %742 = vst [vmem:[%s1531_s30 + $0xd0] sm:$0xff] %v710_v23 }
 0x133   : > { %v675_v12 = vmul.f32 %v1030_v52, %v1023_v49 }
 0x135   : > { %v713_v20 = vmul.f32 %v1511_v47, %v675_v12  ;;  %v1025_v11 = vpop.eup %1024 }
 0x136   : > { %v674_v6 = vmul.f32 %v1031_v53, %v1025_v11 }
 0x137   : > { %745 = vst [vmem:[%s1531_s30 + $0xe8] sm:$0xff] %v713_v20  ;;  %v1027_v17 = vpop.eup %1026 }
 0x138   : > { %v712_v19 = vmul.f32 %v1511_v47, %v674_v6  ;;  %v677_v34 = vmul.f32 %v1032_v27, %v1027_v17  ;;  %v1029_v2 = vpop.eup %1028 }
 0x139   : > { %v676_v22 = vmul.f32 %v1033_v13, %v1029_v2 }
 0x13a   : > { %744 = vst [vmem:[%s1531_s30 + $0xe0] sm:$0xff] %v712_v19  ;;  %v715_v18 = vmul.f32 %v1511_v47, %v677_v34 }
 0x13b   : > { %v714_v24 = vmul.f32 %v1511_v47, %v676_v22 }
 0x13c   : > { %747 = vst [vmem:[%s1531_s30 + $0xf8] sm:$0xff] %v715_v18 }
 0x13d   : > { %746 = vst [vmem:[%s1531_s30 + $0xf0] sm:$0xff] %v714_v24 }
 0x13e   : > { %1075 = shalt.err (!%p1072_p10)
}
 0x13f   : > { %s1076_s24 = scalar_lea.hbm %s1837_s14, 4096  ;;  %s1080_s29 = scalar_lea.hbm %s1887_s2, 8192 }
 0x140   : > { %p1077_p0 = scmp.ne.s32.totalorder %s1837_s14, %s1076_s24  ;;  %p1081_p1 = scmp.lt.s32.totalorder %s1837_s14, %s1887_s2 }
 0x141   : > { %p1082_p3 = scmp.lt.s32.totalorder %s1080_s29, %s1076_s24 }
 0x142   : > { %p1078_p2 = pnand %p1077_p0, %p1896_p12 }
 0x143   : > { %p1083_p6 = por %p1082_p3, %p1081_p1 }
 0x144   : > { %p1079_p9 = pneg %p1078_p2 }
 0x146   : > { %p1084_p11 = pnand %p1083_p6, %p1079_p9 }
 0x148   : > { %1087 = shalt.err (!%p1084_p11)
}
 0x149   : > { %s1132_s20 = smov 128   ;;  %s1133_s28 = smov 8  }
 0x14a   : > { %854 = dma.vmem_to_hbm [thread:$0]  (%p1896_p12), %s1839_s4, 4096, %s1837_s14, %s749_s13, %s1132_s20, %s1132_s20, %s1133_s28  }
 0x14b PF: > { %s777_s30 = sand.u32 1, %s1114_s9   ;;  %p1897_p13 = scmp.ne.s32.totalorder %s1893_s22, 0 }
 0x14c   : > { %p1898_p4 = scmp.ge.s32.totalorder %s1126_s12, 2  ;;  %s778_s3 = scalar_lea.sflag [#allocation4], %s777_s30 }
 0x14e   : > { %p861_p5 = pnand %p1898_p4, %p1897_p13 }
 0x150   : > { %p862_p7 = pneg %p861_p5 }
 0x152   : > { %1109 = dma.done.wait (%p862_p7), %s778_s3, 4096  }
 0x153   : > { %1111 = vsyncadd (%p862_p7), %s778_s3, 4294963200  ;;  %p15_p8 = scmp.ge.s32.totalorder %s1174_s15, 4   ;;  %s1899_s9 = smov %s1118_s10 }
 0x154   : > { %s1900_s10 = smov %s1122_s11  ;;  %s1901_s11 = smov %s1186_s18 }
 0x155   : > { %s1902_s12 = smov %s1174_s15  ;;  %17 = sbr.rel (!%p15_p8) target bundleno = 5 (0x5), region = 73 }
 0x15a   :  { %783 = vsyncpa [#allocation3], 1 }
 0x15b   :  { %785 = vsyncpa [#allocation3 + $0x1], 1 }
 0x15c   :  { %786 = vsyncpa [#allocation4], 1 }
 0x15d   :  { %788 = vsyncpa [#allocation4 + $0x1], 1 }

</bundles_post_ra>
